<compile_context>
chip_gen: v7x
topology: tpu7x:2x2x1
jax: 0.10.0
libtpu: 0.0.40
codegen_flags: <defaults>
</compile_context>

<pallas_src>
import numpy as np
import jax
import jax.numpy as jnp
from jax import lax
from jax.experimental import pallas as pl
from jax.experimental.pallas import tpu as pltpu

EPSILON = float(np.finfo(np.float32).eps)

# contract last dim of both operands: a (B, K) x w (N, K) -> (B, N) == a @ w.T
_CDIMS = (((1,), (1,)), ((), ()))


def _round_up(n, m):
    return ((n + m - 1) // m) * m


def _pad_to(a, target_shape):
    pads = [(0, t - s) for s, t in zip(a.shape, target_shape)]
    return jnp.pad(a, pads)


def _compiler_params(est_vmem_bytes, dims):
    kwargs = dict(dimension_semantics=dims)
    # Default scoped VMEM is ~16-32 MiB; only raise when needed, cap at v7x's 64 MiB.
    if est_vmem_bytes > 24 * 1024 * 1024:
        kwargs["vmem_limit_bytes"] = int(min(2 * est_vmem_bytes, 64 * 1024 * 1024))
    return pltpu.CompilerParams(**kwargs)


# ----------------------------------------------------------------------------
# Fused path: whole weight stack resident in VMEM, one grid step per batch tile,
# layers unrolled with STATIC indices into the weight stack.
# ----------------------------------------------------------------------------
def _make_fused_kernel(n_layers, l_1, l_2):
    c0 = l_1 + EPSILON

    def kernel(h0_ref, x_ref, w1_ref, w2_ref, out_ref):
        x = x_ref[...]                                   # (tb, Fp) hoisted
        h = h0_ref[...]                                  # (tb, Cp)
        for l in range(n_layers):                        # static slices -> no copies
            denom = lax.dot_general(h, w1_ref[l], _CDIMS,
                                    preferred_element_type=jnp.float32)
            denom = denom + l_2 * h + c0
            numer = lax.dot_general(x, w2_ref[l], _CDIMS,
                                    preferred_element_type=jnp.float32)
            h = numer * pl.reciprocal(denom, approx=False) * h
        out_ref[...] = h.astype(out_ref.dtype)

    return kernel


def _fused_call(h_p, x_p, w1_p, w2_p, l_1, l_2, tb):
    n_layers, Cp, Fp = w2_p.shape
    Bp = h_p.shape[0]
    n_bt = Bp // tb
    est = 4 * (4 * tb * Cp + 2 * tb * Fp + 2 * n_layers * (Cp * Cp + Cp * Fp))
    return pl.pallas_call(
        _make_fused_kernel(n_layers, l_1, l_2),
        out_shape=jax.ShapeDtypeStruct((Bp, Cp), jnp.float32),
        grid_spec=pltpu.PrefetchScalarGridSpec(
            num_scalar_prefetch=0,
            grid=(n_bt,),
            in_specs=[
                pl.BlockSpec((tb, Cp), lambda b: (b, 0)),               # h0 tile
                pl.BlockSpec((tb, Fp), lambda b: (b, 0)),               # x tile
                pl.BlockSpec((n_layers, Cp, Cp), lambda b: (0, 0, 0)),  # W1 stack
                pl.BlockSpec((n_layers, Cp, Fp), lambda b: (0, 0, 0)),  # W2 stack
            ],
            out_specs=pl.BlockSpec((tb, Cp), lambda b: (b, 0)),
        ),
        compiler_params=_compiler_params(est, ("parallel",)),
    )(h_p, x_p, w1_p, w2_p)


# ----------------------------------------------------------------------------
# Layered path: stream W1[l]/W2[l] per grid step; h accumulated in resident
# out_ref across the (last, sequential) layer axis; batch axis is "parallel".
# ----------------------------------------------------------------------------
def _make_layered_kernel(l_1, l_2):
    c0 = l_1 + EPSILON

    def kernel(h0_ref, x_ref, w1_ref, w2_ref, out_ref):
        @pl.when(pl.program_id(1) == 0)
        def _():
            out_ref[...] = h0_ref[...]

        h = out_ref[...]                                 # resident across layers
        denom = lax.dot_general(h, w1_ref[...], _CDIMS,
                                preferred_element_type=jnp.float32)
        denom = denom + l_2 * h + c0
        numer = lax.dot_general(x_ref[...], w2_ref[...], _CDIMS,
                                preferred_element_type=jnp.float32)
        out_ref[...] = numer * pl.reciprocal(denom, approx=False) * h

    return kernel


def _layered_call(h_p, x_p, w1_p, w2_p, l_1, l_2, tb):
    n_layers, Cp, Fp = w2_p.shape
    Bp = h_p.shape[0]
    n_bt = Bp // tb
    est = 4 * (4 * tb * Cp + 2 * tb * Fp + 2 * (Cp * Cp + Cp * Fp) + tb * Cp)
    return pl.pallas_call(
        _make_layered_kernel(l_1, l_2),
        out_shape=jax.ShapeDtypeStruct((Bp, Cp), jnp.float32),
        grid_spec=pltpu.PrefetchScalarGridSpec(
            num_scalar_prefetch=0,
            grid=(n_bt, n_layers),
            in_specs=[
                pl.BlockSpec((tb, Cp), lambda b, l: (b, 0)),                      # h0
                pl.BlockSpec((tb, Fp), lambda b, l: (b, 0)),                      # x
                pl.BlockSpec((pl.Squeezed(), Cp, Cp), lambda b, l: (l, 0, 0)),    # W1[l]
                pl.BlockSpec((pl.Squeezed(), Cp, Fp), lambda b, l: (l, 0, 0)),    # W2[l]
            ],
            out_specs=pl.BlockSpec((tb, Cp), lambda b, l: (b, 0)),
        ),
        compiler_params=_compiler_params(est, ("parallel", "arbitrary")),
    )(h_p, x_p, w1_p, w2_p)


# ----------------------------------------------------------------------------
# Public wrapper
# ----------------------------------------------------------------------------
def unsupernet_forward(h, x, w1_stack, w2_stack, l_1=0.0, l_2=0.0,
                       force_layered=False):
    """Full n_layers UnsuperNet forward in a single pallas_call."""
    n_layers, comp, _ = w1_stack.shape
    features = w2_stack.shape[2]
    batch = h.shape[0]
    assert h.shape == (batch, comp)
    assert x.shape == (batch, features)
    assert w2_stack.shape == (n_layers, comp, features)

    # Lane-dense padding: lanes (last dim) -> x128, sublanes/batch -> x8 or tile.
    # Padded comp columns of h stay exactly 0 through every layer because the
    # padded rows of W1/W2 are 0 (numerator = 0) and denom >= l_1 + EPS > 0;
    # padded batch rows stay 0 for the same reason.
    Cp = _round_up(comp, 128)
    Fp = _round_up(features, 128)

    TB_MAX = 256
    Bp = _round_up(batch, 8)
    if Bp > TB_MAX:
        Bp = _round_up(batch, TB_MAX)
        tb = TB_MAX
    else:
        tb = Bp

    h_p = _pad_to(h.astype(jnp.float32), (Bp, Cp))
    x_p = _pad_to(x.astype(jnp.float32), (Bp, Fp))
    w1_p = _pad_to(w1_stack.astype(jnp.float32), (n_layers, Cp, Cp))
    w2_p = _pad_to(w2_stack.astype(jnp.float32), (n_layers, Cp, Fp))

    weight_bytes = 4 * n_layers * (Cp * Cp + Cp * Fp)
    use_fused = (not force_layered) and weight_bytes <= 8 * 1024 * 1024

    if use_fused:
        out_p = _fused_call(h_p, x_p, w1_p, w2_p, float(l_1), float(l_2), tb)
    else:
        out_p = _layered_call(h_p, x_p, w1_p, w2_p, float(l_1), float(l_2), tb)

    return out_p[:batch, :comp].astype(h.dtype)


def unsupernet_reference(h, x, w1_stack, w2_stack, l_1=0.0, l_2=0.0):
    """Plain-JAX reference mirroring the PyTorch forward."""
    for l in range(w1_stack.shape[0]):
        denom = h @ w1_stack[l].T + l_2 * h + l_1 + EPSILON
        numer = x @ w2_stack[l].T
        h = (numer / denom) * h
    return h


if __name__ == "__main__":
    batch, comp, features, n_layers = 8, 32, 64, 4
    l_1, l_2 = 0.1, 0.2

    key = jax.random.PRNGKey(0)
    k_h, k_x, k_w1, k_w2 = jax.random.split(key, 4)

    # NMF-style nonnegative inputs/weights (multiplicative update stays well behaved).
    h0 = jax.random.uniform(k_h, (batch, comp), jnp.float32, 0.1, 1.0)
    x = jax.random.uniform(k_x, (batch, features), jnp.float32, 0.1, 1.0)
    w1 = jax.random.uniform(k_w1, (n_layers, comp, comp), jnp.float32, 0.0, 0.5)
    w2 = jax.random.uniform(k_w2, (n_layers, comp, features), jnp.float32, 0.0, 0.5)

    ref = unsupernet_reference(h0, x, w1, w2, l_1=l_1, l_2=l_2)

    # Fused single-step path (default for small weight stacks).
    out_fused = jax.block_until_ready(
        unsupernet_forward(h0, x, w1, w2, l_1=l_1, l_2=l_2))
    np.testing.assert_allclose(np.asarray(out_fused), np.asarray(ref),
                               rtol=1e-5, atol=1e-5)

    # Layered (per-layer weight streaming) path, used when stacks don't fit VMEM.
    out_layered = jax.block_until_ready(
        unsupernet_forward(h0, x, w1, w2, l_1=l_1, l_2=l_2, force_layered=True))
    np.testing.assert_allclose(np.asarray(out_layered), np.asarray(ref),
                               rtol=1e-5, atol=1e-5)

    print("KERNEL_OK")
</pallas_src>

<mosaic_0001>
module attributes {stable_mosaic.version = 11 : i64} {
  func.func @kernel(%arg0: i32, %arg1: memref<8x128xf32, #tpu.memory_space<vmem>>, %arg2: memref<8x128xf32, #tpu.memory_space<vmem>>, %arg3: memref<4x128x128xf32, #tpu.memory_space<vmem>>, %arg4: memref<4x128x128xf32, #tpu.memory_space<vmem>>, %arg5: memref<8x128xf32, #tpu.memory_space<vmem>>) attributes {dimension_semantics = [#tpu.dimension_semantics<parallel>], iteration_bounds = array<i64: 1>, scalar_prefetch = 0 : i64, scratch_operands = 0 : i64, tpu.core_type = #tpu.core_type<tc>, window_params = [{transform_indices = @transform_0, window_bounds = array<i64: 8, 128>}, {transform_indices = @transform_1, window_bounds = array<i64: 8, 128>}, {pipeline_mode = #tpu.pipeline_mode<synchronous>, transform_indices = @transform_2, window_bounds = array<i64: 4, 128, 128>}, {pipeline_mode = #tpu.pipeline_mode<synchronous>, transform_indices = @transform_3, window_bounds = array<i64: 4, 128, 128>}, {transform_indices = @transform_4, window_bounds = array<i64: 8, 128>}]} {
    %c0 = arith.constant 0 : index
    %c0_0 = arith.constant 0 : index
    %0 = vector.load %arg2[%c0, %c0_0] : memref<8x128xf32, #tpu.memory_space<vmem>>, vector<8x128xf32>
    %c0_1 = arith.constant 0 : index
    %c0_2 = arith.constant 0 : index
    %1 = vector.load %arg1[%c0_1, %c0_2] : memref<8x128xf32, #tpu.memory_space<vmem>>, vector<8x128xf32>
    %c0_3 = arith.constant 0 : index
    %c0_4 = arith.constant 0 : index
    %c0_5 = arith.constant 0 : index
    %2 = vector.load %arg3[%c0_3, %c0_4, %c0_5] : memref<4x128x128xf32, #tpu.memory_space<vmem>>, vector<1x128x128xf32>
    %3 = vector.shape_cast %2 : vector<1x128x128xf32> to vector<128x128xf32>
    %cst = arith.constant dense<0.000000e+00> : vector<8x128xf32>
    %4 = tpu.matmul %1, %3, %cst {dimension_numbers = #tpu.dot_dimension_numbers<[1], [1], [0], [0], [0, 0, 1, 0], [], []>} : vector<8x128xf32>, vector<128x128xf32>, vector<8x128xf32> -> vector<8x128xf32>
    %cst_6 = arith.constant 2.000000e-01 : f32
    %5 = vector.broadcast %cst_6 : f32 to vector<8x128xf32>
    %6 = arith.mulf %5, %1 : vector<8x128xf32>
    %7 = arith.addf %4, %6 : vector<8x128xf32>
    %cst_7 = arith.constant 0.100000121 : f32
    %8 = vector.broadcast %cst_7 : f32 to vector<8x128xf32>
    %9 = arith.addf %7, %8 : vector<8x128xf32>
    %c0_8 = arith.constant 0 : index
    %c0_9 = arith.constant 0 : index
    %c0_10 = arith.constant 0 : index
    %10 = vector.load %arg4[%c0_8, %c0_9, %c0_10] : memref<4x128x128xf32, #tpu.memory_space<vmem>>, vector<1x128x128xf32>
    %11 = vector.shape_cast %10 : vector<1x128x128xf32> to vector<128x128xf32>
    %cst_11 = arith.constant dense<0.000000e+00> : vector<8x128xf32>
    %12 = tpu.matmul %0, %11, %cst_11 {dimension_numbers = #tpu.dot_dimension_numbers<[1], [1], [0], [0], [0, 0, 1, 0], [], []>} : vector<8x128xf32>, vector<128x128xf32>, vector<8x128xf32> -> vector<8x128xf32>
    %13 = tpu.reciprocal %9 : vector<8x128xf32> -> vector<8x128xf32>
    %14 = arith.mulf %12, %13 : vector<8x128xf32>
    %15 = arith.mulf %14, %1 : vector<8x128xf32>
    %c1 = arith.constant 1 : index
    %c0_12 = arith.constant 0 : index
    %c0_13 = arith.constant 0 : index
    %16 = vector.load %arg3[%c1, %c0_12, %c0_13] : memref<4x128x128xf32, #tpu.memory_space<vmem>>, vector<1x128x128xf32>
    %17 = vector.shape_cast %16 : vector<1x128x128xf32> to vector<128x128xf32>
    %cst_14 = arith.constant dense<0.000000e+00> : vector<8x128xf32>
    %18 = tpu.matmul %15, %17, %cst_14 {dimension_numbers = #tpu.dot_dimension_numbers<[1], [1], [0], [0], [0, 0, 1, 0], [], []>} : vector<8x128xf32>, vector<128x128xf32>, vector<8x128xf32> -> vector<8x128xf32>
    %cst_15 = arith.constant 2.000000e-01 : f32
    %19 = vector.broadcast %cst_15 : f32 to vector<8x128xf32>
    %20 = arith.mulf %19, %15 : vector<8x128xf32>
    %21 = arith.addf %18, %20 : vector<8x128xf32>
    %cst_16 = arith.constant 0.100000121 : f32
    %22 = vector.broadcast %cst_16 : f32 to vector<8x128xf32>
    %23 = arith.addf %21, %22 : vector<8x128xf32>
    %c1_17 = arith.constant 1 : index
    %c0_18 = arith.constant 0 : index
    %c0_19 = arith.constant 0 : index
    %24 = vector.load %arg4[%c1_17, %c0_18, %c0_19] : memref<4x128x128xf32, #tpu.memory_space<vmem>>, vector<1x128x128xf32>
    %25 = vector.shape_cast %24 : vector<1x128x128xf32> to vector<128x128xf32>
    %cst_20 = arith.constant dense<0.000000e+00> : vector<8x128xf32>
    %26 = tpu.matmul %0, %25, %cst_20 {dimension_numbers = #tpu.dot_dimension_numbers<[1], [1], [0], [0], [0, 0, 1, 0], [], []>} : vector<8x128xf32>, vector<128x128xf32>, vector<8x128xf32> -> vector<8x128xf32>
    %27 = tpu.reciprocal %23 : vector<8x128xf32> -> vector<8x128xf32>
    %28 = arith.mulf %26, %27 : vector<8x128xf32>
    %29 = arith.mulf %28, %15 : vector<8x128xf32>
    %c2 = arith.constant 2 : index
    %c0_21 = arith.constant 0 : index
    %c0_22 = arith.constant 0 : index
    %30 = vector.load %arg3[%c2, %c0_21, %c0_22] : memref<4x128x128xf32, #tpu.memory_space<vmem>>, vector<1x128x128xf32>
    %31 = vector.shape_cast %30 : vector<1x128x128xf32> to vector<128x128xf32>
    %cst_23 = arith.constant dense<0.000000e+00> : vector<8x128xf32>
    %32 = tpu.matmul %29, %31, %cst_23 {dimension_numbers = #tpu.dot_dimension_numbers<[1], [1], [0], [0], [0, 0, 1, 0], [], []>} : vector<8x128xf32>, vector<128x128xf32>, vector<8x128xf32> -> vector<8x128xf32>
    %cst_24 = arith.constant 2.000000e-01 : f32
    %33 = vector.broadcast %cst_24 : f32 to vector<8x128xf32>
    %34 = arith.mulf %33, %29 : vector<8x128xf32>
    %35 = arith.addf %32, %34 : vector<8x128xf32>
    %cst_25 = arith.constant 0.100000121 : f32
    %36 = vector.broadcast %cst_25 : f32 to vector<8x128xf32>
    %37 = arith.addf %35, %36 : vector<8x128xf32>
    %c2_26 = arith.constant 2 : index
    %c0_27 = arith.constant 0 : index
    %c0_28 = arith.constant 0 : index
    %38 = vector.load %arg4[%c2_26, %c0_27, %c0_28] : memref<4x128x128xf32, #tpu.memory_space<vmem>>, vector<1x128x128xf32>
    %39 = vector.shape_cast %38 : vector<1x128x128xf32> to vector<128x128xf32>
    %cst_29 = arith.constant dense<0.000000e+00> : vector<8x128xf32>
    %40 = tpu.matmul %0, %39, %cst_29 {dimension_numbers = #tpu.dot_dimension_numbers<[1], [1], [0], [0], [0, 0, 1, 0], [], []>} : vector<8x128xf32>, vector<128x128xf32>, vector<8x128xf32> -> vector<8x128xf32>
    %41 = tpu.reciprocal %37 : vector<8x128xf32> -> vector<8x128xf32>
    %42 = arith.mulf %40, %41 : vector<8x128xf32>
    %43 = arith.mulf %42, %29 : vector<8x128xf32>
    %c3 = arith.constant 3 : index
    %c0_30 = arith.constant 0 : index
    %c0_31 = arith.constant 0 : index
    %44 = vector.load %arg3[%c3, %c0_30, %c0_31] : memref<4x128x128xf32, #tpu.memory_space<vmem>>, vector<1x128x128xf32>
    %45 = vector.shape_cast %44 : vector<1x128x128xf32> to vector<128x128xf32>
    %cst_32 = arith.constant dense<0.000000e+00> : vector<8x128xf32>
    %46 = tpu.matmul %43, %45, %cst_32 {dimension_numbers = #tpu.dot_dimension_numbers<[1], [1], [0], [0], [0, 0, 1, 0], [], []>} : vector<8x128xf32>, vector<128x128xf32>, vector<8x128xf32> -> vector<8x128xf32>
    %cst_33 = arith.constant 2.000000e-01 : f32
    %47 = vector.broadcast %cst_33 : f32 to vector<8x128xf32>
    %48 = arith.mulf %47, %43 : vector<8x128xf32>
    %49 = arith.addf %46, %48 : vector<8x128xf32>
    %cst_34 = arith.constant 0.100000121 : f32
    %50 = vector.broadcast %cst_34 : f32 to vector<8x128xf32>
    %51 = arith.addf %49, %50 : vector<8x128xf32>
    %c3_35 = arith.constant 3 : index
    %c0_36 = arith.constant 0 : index
    %c0_37 = arith.constant 0 : index
    %52 = vector.load %arg4[%c3_35, %c0_36, %c0_37] : memref<4x128x128xf32, #tpu.memory_space<vmem>>, vector<1x128x128xf32>
    %53 = vector.shape_cast %52 : vector<1x128x128xf32> to vector<128x128xf32>
    %cst_38 = arith.constant dense<0.000000e+00> : vector<8x128xf32>
    %54 = tpu.matmul %0, %53, %cst_38 {dimension_numbers = #tpu.dot_dimension_numbers<[1], [1], [0], [0], [0, 0, 1, 0], [], []>} : vector<8x128xf32>, vector<128x128xf32>, vector<8x128xf32> -> vector<8x128xf32>
    %55 = tpu.reciprocal %51 : vector<8x128xf32> -> vector<8x128xf32>
    %56 = arith.mulf %54, %55 : vector<8x128xf32>
    %57 = arith.mulf %56, %43 : vector<8x128xf32>
    %c0_39 = arith.constant 0 : index
    %c0_40 = arith.constant 0 : index
    %58 = vector.load %arg5[%c0_39, %c0_40] : memref<8x128xf32, #tpu.memory_space<vmem>>, vector<8x128xf32>
    tpu.vector_store %arg5[%c0_39, %c0_40], %57 {strides = array<i32>} : memref<8x128xf32, #tpu.memory_space<vmem>>, vector<8x128xf32>,
    return
  }
  func.func @transform_0(%arg0: i32) -> (i32, i32) {
    %c0_i32 = arith.constant 0 : i32
    %c0_i32_0 = arith.constant 0 : i32
    return %arg0, %c0_i32 : i32, i32
  }
  func.func @transform_1(%arg0: i32) -> (i32, i32) {
    %c0_i32 = arith.constant 0 : i32
    %c0_i32_0 = arith.constant 0 : i32
    return %arg0, %c0_i32 : i32, i32
  }
  func.func @transform_2(%arg0: i32) -> (i32, i32, i32) {
    %c0_i32 = arith.constant 0 : i32
    %c0_i32_0 = arith.constant 0 : i32
    %c0_i32_1 = arith.constant 0 : i32
    %c0_i32_2 = arith.constant 0 : i32
    return %c0_i32, %c0_i32_0, %c0_i32_1 : i32, i32, i32
  }
  func.func @transform_3(%arg0: i32) -> (i32, i32, i32) {
    %c0_i32 = arith.constant 0 : i32
    %c0_i32_0 = arith.constant 0 : i32
    %c0_i32_1 = arith.constant 0 : i32
    %c0_i32_2 = arith.constant 0 : i32
    return %c0_i32, %c0_i32_0, %c0_i32_1 : i32, i32, i32
  }
  func.func @transform_4(%arg0: i32) -> (i32, i32) {
    %c0_i32 = arith.constant 0 : i32
    %c0_i32_0 = arith.constant 0 : i32
    return %arg0, %c0_i32 : i32, i32
  }
}

</mosaic_0001>

<bundles_post_ra>
// kernel: tpu_custom_call.1
= control target key start
LH: loop header
LB: loop body
LE: loop exit
PB: predicated region body
PF: predicated region fallthrough
CT: control target
= control target key end

     0   :  { %9 = vsyncpa [#allocation3], 0  ;;  %s1743_s0 = inlined_call_operand.hbm [shape: f32[8,128], index: 0, kind: input, shape index: {}]   ;;  %s1744_s1 = inlined_call_operand.hbm [shape: f32[8,128], index: 1, kind: input, shape index: {}]   ;;  %s1745_s2 = inlined_call_operand.hbm [shape: f32[4,128,128], index: 2, kind: input, shape index: {}]   ;;  %s1746_s3 = inlined_call_operand.hbm [shape: f32[4,128,128], index: 3, kind: input, shape index: {}]   ;;  %s1747_s4 = inlined_call_operand.hbm [shape: f32[8,128], index: 4, kind: output, shape index: {}]  }
   0x1   :  { %10 = vsyncpa [#allocation6], 0 }
   0x2   :  { %11 = vsyncpa [#allocation9], 0 }
   0x3   :  { %12 = vsyncpa [#allocation4], 0  ;;  %s1547_s15 = smov [#allocation5]   ;;  %s1548_s17 = smov [#allocation2]  }
   0x4   :  { %s29_s16 = sshll.u32 %s1547_s15, 4  ;;  %s19_s18 = sshll.u32 %s1548_s17, 4  ;;  %s30_s16 = int_to_ptr.vmem [resolvable:$true] %s29_s16  ;;  %s20_s18 = int_to_ptr.vmem [resolvable:$true] %s19_s18 }
   0x5   :  { %s1429_s21 = scalar_lea.hbm %s1744_s1, 128 }
   0x6   :  { %p1430_p0 = scmp.ne.s32.totalorder %s1744_s1, %s1429_s21  ;;  %p1433_p1 = scmp.lt.u32.totalorder %s1429_s21, %s1744_s1 }
   0x8   :  { %p1435_p2 = pnand %p1433_p1, %p1430_p0 }
   0xa   :  { %1438 = shalt.err (!%p1435_p2)
}
   0xb   :  { %s1439_s26 = scalar_lea.vmem %s30_s16, 128  ;;  %p1444_p4 = scmp.lt.s32.totalorder %s30_s16, %s30_s16 }
   0xc   :  { %p1440_p3 = scmp.ne.s32.totalorder %s30_s16, %s1439_s26  ;;  %p1445_p5 = scmp.lt.s32.totalorder %s1439_s26, %s1439_s26 }
   0xe   :  { %p1446_p6 = por %p1445_p5, %p1444_p4 }
  0x10   :  { %p1447_p7 = pnand %p1446_p6, %p1440_p3 }
  0x12   :  { %1450 = shalt.err (!%p1447_p7)
}
  0x13   :  { %32 = dma.hbm_to_vmem [thread:$0]  %s1744_s1, 128, %s30_s16, [#allocation6]  }
  0x14   :  { %s1451_s5 = scalar_lea.hbm %s1743_s0, 128 }
  0x15   :  { %p1452_p8 = scmp.ne.s32.totalorder %s1743_s0, %s1451_s5  ;;  %p1455_p9 = scmp.lt.u32.totalorder %s1451_s5, %s1743_s0 }
  0x17   :  { %p1457_p10 = pnand %p1455_p9, %p1452_p8 }
  0x19   :  { %1460 = shalt.err (!%p1457_p10)
}
  0x1a   :  { %s1461_s10 = scalar_lea.vmem %s20_s18, 128  ;;  %p1466_p12 = scmp.lt.s32.totalorder %s20_s18, %s20_s18 }
  0x1b   :  { %p1462_p11 = scmp.ne.s32.totalorder %s20_s18, %s1461_s10  ;;  %p1467_p13 = scmp.lt.s32.totalorder %s1461_s10, %s1461_s10 }
  0x1d   :  { %p1468_p0 = por %p1467_p13, %p1466_p12 }
  0x1f   :  { %p1469_p1 = pnand %p1468_p0, %p1462_p11 }
  0x21   :  { %1472 = shalt.err (!%p1469_p1)
}
  0x22   :  { %22 = dma.hbm_to_vmem [thread:$0]  %s1743_s0, 128, %s20_s18, [#allocation3]  }
  0x23   :  { %s1549_s12 = smov [#allocation7]   ;;  %s1473_s16 = scalar_lea.hbm %s1745_s2, 8192 }
  0x24   :  { %s38_s13 = sshll.u32 %s1549_s12, 4  ;;  %p1474_p2 = scmp.ne.s32.totalorder %s1745_s2, %s1473_s16  ;;  %s39_s13 = int_to_ptr.vmem [resolvable:$true] %s38_s13 }
  0x25   :  { %p1477_p3 = scmp.lt.u32.totalorder %s1473_s16, %s1745_s2 }
  0x27   :  { %p1479_p4 = pnand %p1477_p3, %p1474_p2 }
  0x29   :  { %1482 = shalt.err (!%p1479_p4)
}
  0x2a   :  { %s1483_s22 = scalar_lea.vmem %s39_s13, 8192  ;;  %p1488_p6 = scmp.lt.s32.totalorder %s39_s13, %s39_s13 }
  0x2b   :  { %p1484_p5 = scmp.ne.s32.totalorder %s39_s13, %s1483_s22  ;;  %p1489_p7 = scmp.lt.s32.totalorder %s1483_s22, %s1483_s22 }
  0x2d   :  { %p1490_p8 = por %p1489_p7, %p1488_p6 }
  0x2f   :  { %p1491_p9 = pnand %p1490_p8, %p1484_p5 }
  0x31   :  { %1494 = shalt.err (!%p1491_p9)
}
  0x32   :  { %s1550_s0 = smov 128   ;;  %s1551_s18 = smov 8  }
  0x33   :  { %44 = dma.hbm_to_vmem [thread:$0]  %s1745_s2, 8192, %s39_s13, [#allocation6], %s1550_s0, %s1550_s0, %s1551_s18  }
  0x34   :  { %s1552_s25 = smov [#allocation8]   ;;  %s1495_s29 = scalar_lea.hbm %s1746_s3, 8192 }
  0x35   :  { %s50_s26 = sshll.u32 %s1552_s25, 4  ;;  %p1496_p10 = scmp.ne.s32.totalorder %s1746_s3, %s1495_s29  ;;  %s51_s26 = int_to_ptr.vmem [resolvable:$true] %s50_s26 }
  0x36   :  { %p1499_p11 = scmp.lt.u32.totalorder %s1495_s29, %s1746_s3 }
  0x38   :  { %p1501_p12 = pnand %p1499_p11, %p1496_p10 }
  0x3a   :  { %1504 = shalt.err (!%p1501_p12)
}
  0x3b   :  { %s1505_s8 = scalar_lea.vmem %s51_s26, 8192  ;;  %p1510_p0 = scmp.lt.s32.totalorder %s51_s26, %s51_s26 }
  0x3c   :  { %p1506_p13 = scmp.ne.s32.totalorder %s51_s26, %s1505_s8  ;;  %p1511_p1 = scmp.lt.s32.totalorder %s1505_s8, %s1505_s8 }
  0x3e   :  { %p1512_p2 = por %p1511_p1, %p1510_p0 }
  0x40   :  { %p1513_p3 = pnand %p1512_p2, %p1506_p13 }
  0x42   :  { %1516 = shalt.err (!%p1513_p3)
}
  0x43   :  { %56 = dma.hbm_to_vmem [thread:$0]  %s1746_s3, 8192, %s51_s26, [#allocation9], %s1550_s0, %s1550_s0, %s1551_s18  }
  0x44   :  { %1539 = dma.done.wait [#allocation3], 128  }
  0x45   :  { %1540 = vsyncadd [#allocation3], 4294967168 }
  0x46   :  { %1541 = dma.done.wait [#allocation6], 8320  }
  0x47   :  { %1542 = vsyncadd [#allocation6], 4294958976 }
  0x48   :  { %1543 = dma.done.wait [#allocation9], 8192  }
  0x49   :  { %1544 = vsyncadd [#allocation9], 4294959104  ;;  %v1553_v0 = vmov 0.0|0.0   ;;  %vm1554_vm0 = vmmov 0   ;;  %v1555_v1 = vmov 0.0   ;;  %v71_v2 = vld [vmem:[#allocation7] sm:$0xff] }
  0x4a   :  { %1219 = vmatprep.subr.bf16.mxu0 %v1553_v0  ;;  %1243 = vmatprep.subr.bf16.mxu1 %v1553_v0  ;;  %v72_v3 = vld [vmem:[#allocation7 + $0x8] sm:$0xff]  ;;  %v159_v5 = vld [vmem:[#allocation8] sm:$0xff]  ;;  %v73_v8 = vld [vmem:[#allocation7 + $0x10] sm:$0xff]  ;;  %s1556_s3 = smov [#allocation10]  }
  0x4b   :  { %971 = vmatprep.mubr.msk.f32.mxu0 %vm1554_vm0, %v1555_v1  ;;  %1006 = vmatprep.mubr.msk.f32.mxu1 %vm1554_vm0, %v1555_v1  ;;  %v1220_v4 = vpack.c.bf16 %v72_v3, %v71_v2  ;;  %v160_v6 = vld [vmem:[#allocation8 + $0x8] sm:$0xff]  ;;  %v74_v9 = vld [vmem:[#allocation7 + $0x18] sm:$0xff]  ;;  %v161_v10 = vld [vmem:[#allocation8 + $0x10] sm:$0xff]  ;;  %s792_s10 = sshll.u32 %s1556_s3, 4  ;;  %s793_s10 = int_to_ptr.vmem [resolvable:$true] %s792_s10 }
  0x4c   :  { %v1244_v7 = vpack.c.bf16 %v160_v6, %v159_v5  ;;  %v162_v11 = vld [vmem:[#allocation8 + $0x18] sm:$0xff]  ;;  %v1223_v12 = vpack.c.bf16 %v74_v9, %v73_v8  ;;  %v75_v14 = vld [vmem:[#allocation7 + $0x20] sm:$0xff]  ;;  %v76_v15 = vld [vmem:[#allocation7 + $0x28] sm:$0xff]  ;;  %s1517_s1 = scalar_lea.vmem %s793_s10, 128  ;;  %p1522_p5 = scmp.lt.s32.totalorder %s793_s10, %s793_s10 }
  0x4d   :  { %1221 = vmatpush3.bf16.xpose.msra.mxu0 %v1220_v4  ;;  %v1247_v13 = vpack.c.bf16 %v162_v11, %v161_v10  ;;  %v163_v16 = vld [vmem:[#allocation8 + $0x20] sm:$0xff]  ;;  %v164_v17 = vld [vmem:[#allocation8 + $0x28] sm:$0xff]  ;;  %v1226_v18 = vpack.c.bf16 %v76_v15, %v75_v14  ;;  %v77_v20 = vld [vmem:[#allocation7 + $0x30] sm:$0xff]  ;;  %p1518_p4 = scmp.ne.s32.totalorder %s793_s10, %s1517_s1  ;;  %p1523_p6 = scmp.lt.s32.totalorder %s1517_s1, %s1517_s1 }
  0x4e   :  { %1222 = vmatprep.subr.bf16.mxu0 %v1553_v0  ;;  %1245 = vmatpush3.bf16.xpose.msra.mxu1 %v1244_v7  ;;  %v1250_v19 = vpack.c.bf16 %v164_v17, %v163_v16  ;;  %v78_v21 = vld [vmem:[#allocation7 + $0x38] sm:$0xff]  ;;  %v165_v22 = vld [vmem:[#allocation8 + $0x30] sm:$0xff]  ;;  %v79_v26 = vld [vmem:[#allocation7 + $0x40] sm:$0xff] }
  0x4f   :  { %1246 = vmatprep.subr.bf16.mxu1 %v1553_v0  ;;  %v166_v23 = vld [vmem:[#allocation8 + $0x38] sm:$0xff]  ;;  %v1229_v24 = vpack.c.bf16 %v78_v21, %v77_v20  ;;  %v80_v27 = vld [vmem:[#allocation7 + $0x48] sm:$0xff]  ;;  %v167_v28 = vld [vmem:[#allocation8 + $0x40] sm:$0xff]  ;;  %p1524_p7 = por %p1523_p6, %p1522_p5 }
  0x50   :  { %v1253_v25 = vpack.c.bf16 %v166_v23, %v165_v22  ;;  %v168_v29 = vld [vmem:[#allocation8 + $0x48] sm:$0xff]  ;;  %v1232_v30 = vpack.c.bf16 %v80_v27, %v79_v26  ;;  %v81_v32 = vld [vmem:[#allocation7 + $0x50] sm:$0xff]  ;;  %v82_v33 = vld [vmem:[#allocation7 + $0x58] sm:$0xff] }
  0x51   :  { %v1256_v31 = vpack.c.bf16 %v168_v29, %v167_v28  ;;  %v169_v34 = vld [vmem:[#allocation8 + $0x50] sm:$0xff]  ;;  %v170_v35 = vld [vmem:[#allocation8 + $0x58] sm:$0xff]  ;;  %v1235_v36 = vpack.c.bf16 %v82_v33, %v81_v32  ;;  %v83_v38 = vld [vmem:[#allocation7 + $0x60] sm:$0xff]  ;;  %p1525_p8 = pnand %p1524_p7, %p1518_p4 }
  0x52   :  { %v1259_v37 = vpack.c.bf16 %v170_v35, %v169_v34  ;;  %v84_v39 = vld [vmem:[#allocation7 + $0x68] sm:$0xff]  ;;  %v171_v40 = vld [vmem:[#allocation8 + $0x60] sm:$0xff]  ;;  %v85_v44 = vld [vmem:[#allocation7 + $0x70] sm:$0xff] }
  0x53   :  { %v172_v41 = vld [vmem:[#allocation8 + $0x68] sm:$0xff]  ;;  %v1238_v42 = vpack.c.bf16 %v84_v39, %v83_v38  ;;  %v86_v45 = vld [vmem:[#allocation7 + $0x78] sm:$0xff]  ;;  %v173_v46 = vld [vmem:[#allocation8 + $0x70] sm:$0xff] }
  0x54   :  { %v1262_v43 = vpack.c.bf16 %v172_v41, %v171_v40  ;;  %v174_v47 = vld [vmem:[#allocation8 + $0x78] sm:$0xff]  ;;  %v1241_v48 = vpack.c.bf16 %v86_v45, %v85_v44  ;;  %v249_v50 = vld [vmem:[#allocation7 + $0x80] sm:$0xff]  ;;  %v250_v51 = vld [vmem:[#allocation7 + $0x88] sm:$0xff] }
  0x55   :  { %1224 = vmatpush3.bf16.xpose.msra.mxu0 %v1223_v12  ;;  %v1265_v49 = vpack.c.bf16 %v174_v47, %v173_v46  ;;  %v338_v52 = vld [vmem:[#allocation8 + $0x80] sm:$0xff]  ;;  %v339_v53 = vld [vmem:[#allocation8 + $0x88] sm:$0xff]  ;;  %v1652_v54 = vld [vmem:[#allocation2] sm:$0xff]  ;;  %v1268_v55 = vpack.c.bf16 %v250_v51, %v249_v50 }
  0x56   :  { %1225 = vmatprep.subr.bf16.mxu0 %v1553_v0  ;;  %1248 = vmatpush3.bf16.xpose.msra.mxu1 %v1247_v13  ;;  %v1654_v56 = vld [vmem:[#allocation5] sm:$0xff]  ;;  %v1292_v57 = vpack.c.bf16 %v339_v53, %v338_v52  ;;  %v251_v58 = vld [vmem:[#allocation7 + $0x90] sm:$0xff]  ;;  %v253_v2 = vld [vmem:[#allocation7 + $0xa0] sm:$0xff]  ;;  %v87_v50 = vmul.f32 0.2, %v1652_v54 }
  0x57   :  { %1249 = vmatprep.subr.bf16.mxu1 %v1553_v0  ;;  %v252_v59 = vld [vmem:[#allocation7 + $0x98] sm:$0xff]  ;;  %v340_v60 = vld [vmem:[#allocation8 + $0x90] sm:$0xff]  ;;  %v254_v3 = vld [vmem:[#allocation7 + $0xa8] sm:$0xff] }
  0x58   :  { %v341_v61 = vld [vmem:[#allocation8 + $0x98] sm:$0xff]  ;;  %v1271_v62 = vpack.c.bf16 %v252_v59, %v251_v58  ;;  %v342_v4 = vld [vmem:[#allocation8 + $0xa0] sm:$0xff]  ;;  %v343_v5 = vld [vmem:[#allocation8 + $0xa8] sm:$0xff]  ;;  %v1274_v6 = vpack.c.bf16 %v254_v3, %v253_v2 }
  0x59   :  { %v1295_v63 = vpack.c.bf16 %v341_v61, %v340_v60  ;;  %v1298_v7 = vpack.c.bf16 %v343_v5, %v342_v4  ;;  %v255_v8 = vld [vmem:[#allocation7 + $0xb0] sm:$0xff]  ;;  %v256_v9 = vld [vmem:[#allocation7 + $0xb8] sm:$0xff]  ;;  %v257_v14 = vld [vmem:[#allocation7 + $0xc0] sm:$0xff] }
  0x5a   :  { %v344_v10 = vld [vmem:[#allocation8 + $0xb0] sm:$0xff]  ;;  %v345_v11 = vld [vmem:[#allocation8 + $0xb8] sm:$0xff]  ;;  %v1277_v12 = vpack.c.bf16 %v256_v9, %v255_v8  ;;  %v258_v15 = vld [vmem:[#allocation7 + $0xc8] sm:$0xff] }
  0x5b   :  { %v1301_v13 = vpack.c.bf16 %v345_v11, %v344_v10  ;;  %v1280_v16 = vpack.c.bf16 %v258_v15, %v257_v14  ;;  %v259_v17 = vld [vmem:[#allocation7 + $0xd0] sm:$0xff]  ;;  %v346_v20 = vld [vmem:[#allocation8 + $0xc0] sm:$0xff]  ;;  %v347_v21 = vld [vmem:[#allocation8 + $0xc8] sm:$0xff] }
  0x5c   :  { %v1304_v22 = vpack.c.bf16 %v347_v21, %v346_v20  ;;  %v261_v23 = vld [vmem:[#allocation7 + $0xe0] sm:$0xff]  ;;  %v348_v26 = vld [vmem:[#allocation8 + $0xd0] sm:$0xff]  ;;  %v349_v27 = vld [vmem:[#allocation8 + $0xd8] sm:$0xff] }
  0x5d   :  { %1227 = vmatpush3.bf16.xpose.msra.mxu0 %v1226_v18  ;;  %v260_v18 = vld [vmem:[#allocation7 + $0xd8] sm:$0xff]  ;;  %v263_v28 = vld [vmem:[#allocation7 + $0xf0] sm:$0xff]  ;;  %v350_v32 = vld [vmem:[#allocation8 + $0xe0] sm:$0xff] }
  0x5e   :  { %1228 = vmatprep.subr.bf16.mxu0 %v1553_v0  ;;  %1251 = vmatpush3.bf16.xpose.msra.mxu1 %v1250_v19  ;;  %v1283_v19 = vpack.c.bf16 %v260_v18, %v259_v17  ;;  %v264_v29 = vld [vmem:[#allocation7 + $0xf8] sm:$0xff]  ;;  %v351_v33 = vld [vmem:[#allocation8 + $0xe8] sm:$0xff]  ;;  %v352_v35 = vld [vmem:[#allocation8 + $0xf0] sm:$0xff] }
  0x5f   :  { %1252 = vmatprep.subr.bf16.mxu1 %v1553_v0  ;;  %v1310_v34 = vpack.c.bf16 %v351_v33, %v350_v32  ;;  %v517_v38 = vld [vmem:[#allocation8 + $0x100] sm:$0xff]  ;;  %v518_v39 = vld [vmem:[#allocation8 + $0x108] sm:$0xff]  ;;  %v519_v41 = vld [vmem:[#allocation8 + $0x110] sm:$0xff] }
  0x60   :  { %v1340_v40 = vpack.c.bf16 %v518_v39, %v517_v38  ;;  %v521_v44 = vld [vmem:[#allocation8 + $0x120] sm:$0xff]  ;;  %v522_v45 = vld [vmem:[#allocation8 + $0x128] sm:$0xff]  ;;  %v523_v47 = vld [vmem:[#allocation8 + $0x130] sm:$0xff] }
  0x61   :  { %v1346_v46 = vpack.c.bf16 %v522_v45, %v521_v44  ;;  %v428_v59 = vld [vmem:[#allocation7 + $0x100] sm:$0xff]  ;;  %v429_v60 = vld [vmem:[#allocation7 + $0x108] sm:$0xff]  ;;  %v430_v3 = vld [vmem:[#allocation7 + $0x110] sm:$0xff] }
  0x62   :  { %v431_v4 = vld [vmem:[#allocation7 + $0x118] sm:$0xff]  ;;  %v436_v11 = vld [vmem:[#allocation7 + $0x140] sm:$0xff]  ;;  %v438_v14 = vld [vmem:[#allocation7 + $0x150] sm:$0xff] }
  0x63   :  { %v1319_v5 = vpack.c.bf16 %v431_v4, %v430_v3  ;;  %v435_v9 = vld [vmem:[#allocation7 + $0x138] sm:$0xff]  ;;  %v525_v17 = vld [vmem:[#allocation8 + $0x140] sm:$0xff]  ;;  %v526_v18 = vld [vmem:[#allocation8 + $0x148] sm:$0xff] }
  0x64   :  { %v439_v15 = vld [vmem:[#allocation7 + $0x158] sm:$0xff]  ;;  %v440_v20 = vld [vmem:[#allocation7 + $0x160] sm:$0xff]  ;;  %v441_v21 = vld [vmem:[#allocation7 + $0x168] sm:$0xff] }
  0x65   :  { %1230 = vmatpush3.bf16.xpose.msra.mxu0 %v1229_v24  ;;  %v262_v24 = vld [vmem:[#allocation7 + $0xe8] sm:$0xff]  ;;  %v611_v4 = vld [vmem:[#allocation7 + $0x1a0] sm:$0xff] }
  0x66   :  { %1231 = vmatprep.subr.bf16.mxu0 %v1553_v0  ;;  %1254 = vmatpush3.bf16.xpose.msra.mxu1 %v1253_v25  ;;  %v1286_v25 = vpack.c.bf16 %v262_v24, %v261_v23  ;;  %v527_v23 = vld [vmem:[#allocation8 + $0x150] sm:$0xff]  ;;  %v528_v24 = vld [vmem:[#allocation8 + $0x158] sm:$0xff]  ;;  %v530_v32 = vld [vmem:[#allocation8 + $0x168] sm:$0xff] }
  0x67   :  { %1255 = vmatprep.subr.bf16.mxu1 %v1553_v0  ;;  %v697_v38 = vld [vmem:[#allocation8 + $0x188] sm:$0xff] }
  0x68   :  { %v701_v44 = vld [vmem:[#allocation8 + $0x1a8] sm:$0xff] }
  0x6d   :  { %1233 = vmatpush3.bf16.xpose.msra.mxu0 %v1232_v30  ;;  %v1307_v30 = vpack.c.bf16 %v349_v27, %v348_v26  ;;  %v443_v26 = vld [vmem:[#allocation7 + $0x178] sm:$0xff]  ;;  %v1355_v27 = vpack.c.bf16 %v528_v24, %v527_v23 }
  0x6e   :  { %1234 = vmatprep.subr.bf16.mxu0 %v1553_v0  ;;  %1257 = vmatpush3.bf16.xpose.msra.mxu1 %v1256_v31  ;;  %v1289_v31 = vpack.c.bf16 %v264_v29, %v263_v28 }
  0x6f   :  { %1258 = vmatprep.subr.bf16.mxu1 %v1553_v0 }
  0x75   :  { %1236 = vmatpush3.bf16.xpose.msra.mxu0 %v1235_v36  ;;  %v353_v36 = vld [vmem:[#allocation8 + $0xf8] sm:$0xff] }
  0x76   :  { %1237 = vmatprep.subr.bf16.mxu0 %v1553_v0  ;;  %1260 = vmatpush3.bf16.xpose.msra.mxu1 %v1259_v37  ;;  %v1313_v37 = vpack.c.bf16 %v353_v36, %v352_v35  ;;  %v532_v35 = vld [vmem:[#allocation8 + $0x178] sm:$0xff] }
  0x77   :  { %1261 = vmatprep.subr.bf16.mxu1 %v1553_v0 }
  0x7d   :  { %1239 = vmatpush3.bf16.xpose.msra.mxu0 %v1238_v42  ;;  %v520_v42 = vld [vmem:[#allocation8 + $0x118] sm:$0xff] }
  0x7e   :  { %1240 = vmatprep.subr.bf16.mxu0 %v1553_v0  ;;  %1263 = vmatpush3.bf16.xpose.msra.mxu1 %v1262_v43  ;;  %v1343_v43 = vpack.c.bf16 %v520_v42, %v519_v41  ;;  %v699_v41 = vld [vmem:[#allocation8 + $0x198] sm:$0xff] }
  0x7f   :  { %1264 = vmatprep.subr.bf16.mxu1 %v1553_v0 }
  0x85   :  { %1242 = vmatpush3.bf16.xpose.msra.mxu0 %v1241_v48  ;;  %v524_v48 = vld [vmem:[#allocation8 + $0x138] sm:$0xff] }
  0x86   :  { %1266 = vmatpush3.bf16.xpose.msra.mxu1 %v1265_v49  ;;  %1267 = vmatprep.subr.bf16.mxu0 %v1553_v0  ;;  %v1349_v49 = vpack.c.bf16 %v524_v48, %v523_v47  ;;  %v703_v47 = vld [vmem:[#allocation8 + $0x1b8] sm:$0xff] }
  0x87   :  { %1291 = vmatprep.subr.bf16.mxu1 %v1553_v0 }
  0x8c   :  { %972 = vmatmul.mubr.f32.vlgmr.msra.gmra.mrb[0].mxu0 %v1652_v54 }
  0x8d   :  { %1007 = vmatmul.mubr.f32.vlgmr.msra.gmra.mrb[0].mxu1 %v1654_v56  ;;  %1269 = vmatpush3.bf16.xpose.msra.mxu0 %v1268_v55 }
  0x8e   :  { %1270 = vmatprep.subr.bf16.mxu0 %v1553_v0  ;;  %1293 = vmatpush3.bf16.xpose.msra.mxu1 %v1292_v57 }
  0x8f   :  { %1294 = vmatprep.subr.bf16.mxu1 %v1553_v0  ;;  %1041 = vmatprep.mubr.msk.f32.mxu0 %vm1554_vm0, %v1555_v1 }
  0x90   :  { %1076 = vmatprep.mubr.msk.f32.mxu1 %vm1554_vm0, %v1555_v1 }
  0x95   :  { %1272 = vmatpush3.bf16.xpose.msra.mxu0 %v1271_v62 }
  0x96   :  { %1273 = vmatprep.subr.bf16.mxu0 %v1553_v0  ;;  %1296 = vmatpush3.bf16.xpose.msra.mxu1 %v1295_v63  ;;  %v1316_v63 = vpack.c.bf16 %v429_v60, %v428_v59 }
  0x97   :  { %1297 = vmatprep.subr.bf16.mxu1 %v1553_v0 }
  0x9d   :  { %1275 = vmatpush3.bf16.xpose.msra.mxu0 %v1274_v6  ;;  %v432_v6 = vld [vmem:[#allocation7 + $0x120] sm:$0xff] }
  0x9e   :  { %1276 = vmatprep.subr.bf16.mxu0 %v1553_v0  ;;  %1299 = vmatpush3.bf16.xpose.msra.mxu1 %v1298_v7  ;;  %v433_v7 = vld [vmem:[#allocation7 + $0x128] sm:$0xff] }
  0x9f   :  { %1300 = vmatprep.subr.bf16.mxu1 %v1553_v0  ;;  %v1322_v8 = vpack.c.bf16 %v433_v7, %v432_v6  ;;  %v614_v7 = vld [vmem:[#allocation7 + $0x1b8] sm:$0xff] }
  0xa5   :  { %1278 = vmatpush3.bf16.xpose.msra.mxu0 %v1277_v12  ;;  %v437_v12 = vld [vmem:[#allocation7 + $0x148] sm:$0xff] }
  0xa6   :  { %1279 = vmatprep.subr.bf16.mxu0 %v1553_v0  ;;  %1302 = vmatpush3.bf16.xpose.msra.mxu1 %v1301_v13  ;;  %v1328_v13 = vpack.c.bf16 %v437_v12, %v436_v11  ;;  %v618_v11 = vld [vmem:[#allocation7 + $0x1d8] sm:$0xff] }
  0xa7   :  { %1303 = vmatprep.subr.bf16.mxu1 %v1553_v0 }
  0xad   :  { %1281 = vmatpush3.bf16.xpose.msra.mxu0 %v1280_v16  ;;  %v1331_v16 = vpack.c.bf16 %v439_v15, %v438_v14  ;;  %v705_v14 = vld [vmem:[#allocation8 + $0x1c8] sm:$0xff] }
  0xae   :  { %1282 = vmatprep.subr.bf16.mxu0 %v1553_v0  ;;  %1305 = vmatpush3.bf16.xpose.msra.mxu1 %v1304_v22  ;;  %v1334_v22 = vpack.c.bf16 %v441_v21, %v440_v20  ;;  %v707_v20 = vld [vmem:[#allocation8 + $0x1d8] sm:$0xff]  ;;  %v621_v21 = vld [vmem:[#allocation7 + $0x1f0] sm:$0xff] }
  0xaf   :  { %1306 = vmatprep.subr.bf16.mxu1 %v1553_v0 }
  0xb5   :  { %1284 = vmatpush3.bf16.xpose.msra.mxu0 %v1283_v19  ;;  %v1352_v19 = vpack.c.bf16 %v526_v18, %v525_v17  ;;  %v620_v17 = vld [vmem:[#allocation7 + $0x1e8] sm:$0xff] }
  0xb6   :  { %1285 = vmatprep.subr.bf16.mxu0 %v1553_v0  ;;  %1308 = vmatpush3.bf16.xpose.msra.mxu1 %v1307_v30 }
  0xb7   :  { %1309 = vmatprep.subr.bf16.mxu1 %v1553_v0 }
  0xbd   :  { %1287 = vmatpush3.bf16.xpose.msra.mxu0 %v1286_v25  ;;  %v442_v25 = vld [vmem:[#allocation7 + $0x170] sm:$0xff] }
  0xbe   :  { %1288 = vmatprep.subr.bf16.mxu0 %v1553_v0  ;;  %1311 = vmatpush3.bf16.xpose.msra.mxu1 %v1310_v34  ;;  %v1337_v28 = vpack.c.bf16 %v443_v26, %v442_v25  ;;  %v531_v34 = vld [vmem:[#allocation8 + $0x170] sm:$0xff] }
  0xbf   :  { %1312 = vmatprep.subr.bf16.mxu1 %v1553_v0  ;;  %v1361_v36 = vpack.c.bf16 %v532_v35, %v531_v34 }
  0xc5   :  { %1290 = vmatpush3.bf16.xpose.msra.mxu0 %v1289_v31  ;;  %v529_v31 = vld [vmem:[#allocation8 + $0x160] sm:$0xff] }
  0xc6   :  { %1315 = vmatprep.subr.bf16.mxu0 %v1553_v0  ;;  %1314 = vmatpush3.bf16.xpose.msra.mxu1 %v1313_v37  ;;  %v1358_v33 = vpack.c.bf16 %v530_v32, %v529_v31  ;;  %v696_v37 = vld [vmem:[#allocation8 + $0x180] sm:$0xff]  ;;  %v711_v31 = vld [vmem:[#allocation8 + $0x1f8] sm:$0xff] }
  0xc7   :  { %1339 = vmatprep.subr.bf16.mxu1 %v1553_v0  ;;  %v1388_v39 = vpack.c.bf16 %v697_v38, %v696_v37 }
  0xcd   :  { %1077 = vmatmul.mubr.f32.vlgmr.msra.gmra.mrb[2].mxu1 %v1654_v56 }
  0xce   :  { %1341 = vmatpush3.bf16.xpose.msra.mxu1 %v1340_v40  ;;  %1146 = vmatprep.mubr.msk.f32.mxu1 %vm1554_vm0, %v1555_v1  ;;  %v698_v40 = vld [vmem:[#allocation8 + $0x190] sm:$0xff] }
  0xcf   :  { %1342 = vmatprep.subr.bf16.mxu1 %v1553_v0  ;;  %v1391_v42 = vpack.c.bf16 %v699_v41, %v698_v40 }
  0xd6   :  { %1344 = vmatpush3.bf16.xpose.msra.mxu1 %v1343_v43  ;;  %v700_v43 = vld [vmem:[#allocation8 + $0x1a0] sm:$0xff] }
  0xd7   :  { %1345 = vmatprep.subr.bf16.mxu1 %v1553_v0  ;;  %v1394_v45 = vpack.c.bf16 %v701_v44, %v700_v43 }
  0xde   :  { %1347 = vmatpush3.bf16.xpose.msra.mxu1 %v1346_v46  ;;  %v702_v46 = vld [vmem:[#allocation8 + $0x1b0] sm:$0xff] }
  0xdf   :  { %1348 = vmatprep.subr.bf16.mxu1 %v1553_v0  ;;  %v1397_v48 = vpack.c.bf16 %v703_v47, %v702_v46 }
  0xe6   :  { %1350 = vmatpush3.bf16.xpose.msra.mxu1 %v1349_v49 }
  0xe7   :  { %1351 = vmatprep.subr.bf16.mxu1 %v1553_v0 }
  0xee   :  { %1353 = vmatpush3.bf16.xpose.msra.mxu1 %v1352_v19  ;;  %v706_v19 = vld [vmem:[#allocation8 + $0x1d0] sm:$0xff] }
  0xef   :  { %1354 = vmatprep.subr.bf16.mxu1 %v1553_v0  ;;  %v1403_v23 = vpack.c.bf16 %v707_v20, %v706_v19 }
  0xf6   :  { %1356 = vmatpush3.bf16.xpose.msra.mxu1 %v1355_v27  ;;  %v708_v27 = vld [vmem:[#allocation8 + $0x1e0] sm:$0xff] }
  0xf7   :  { %1357 = vmatprep.subr.bf16.mxu1 %v1553_v0 }
  0xfe   :  { %1359 = vmatpush3.bf16.xpose.msra.mxu1 %v1358_v33 }
  0xff   :  { %1360 = vmatprep.subr.bf16.mxu1 %v1553_v0 }
 0x106   :  { %1362 = vmatpush3.bf16.xpose.msra.mxu1 %v1361_v36 }
 0x107   :  { %1387 = vmatprep.subr.bf16.mxu1 %v1553_v0 }
 0x10d   :  { %1147 = vmatmul.mubr.f32.vlgmr.msra.gmra.mrb[4].mxu1 %v1654_v56 }
 0x10e   :  { %1389 = vmatpush3.bf16.xpose.msra.mxu1 %v1388_v39  ;;  %1216 = vmatprep.mubr.msk.f32.mxu1 %vm1554_vm0, %v1555_v1 }
 0x10f   :  { %1390 = vmatprep.subr.bf16.mxu1 %v1553_v0 }
 0x116   :  { %1392 = vmatpush3.bf16.xpose.msra.mxu1 %v1391_v42 }
 0x117   :  { %1393 = vmatprep.subr.bf16.mxu1 %v1553_v0 }
 0x11e   :  { %1395 = vmatpush3.bf16.xpose.msra.mxu1 %v1394_v45 }
 0x11f   :  { %1396 = vmatprep.subr.bf16.mxu1 %v1553_v0 }
 0x126   :  { %1398 = vmatpush3.bf16.xpose.msra.mxu1 %v1397_v48 }
 0x127   :  { %1399 = vmatprep.subr.bf16.mxu1 %v1553_v0 }
 0x15f   :  { %v154_v51 = vpop.f32.mrb[0].mxu0 }
 0x160   :  { %v155_v52 = vadd.f32 %v154_v51, %v87_v50  ;;  %v973_v53 = vpop.f32.mrb[1].mxu0  ;;  %v241_v55 = vpop.f32.mrb[0].mxu1 }
 0x161   :  { %v1008_v57 = vpop.f32.mrb[1].mxu1 }
 0x162   :  { %v158_v58 = vadd.f32 0.10000012, %v155_v52  ;;  %v608_v57 = vld [vmem:[#allocation7 + $0x188] sm:$0xff] }
 0x164   :  { %1421 = vrcp.f32 %v158_v58 }
 0x16e   :  { %v1422_v61 = vpop.eup %1421 }
 0x16f   :  { %v246_v62 = vmul.f32 %v1422_v61, %v241_v55  ;;  %v607_v55 = vld [vmem:[#allocation7 + $0x180] sm:$0xff] }
 0x170   :  { %v1364_v60 = vpack.c.bf16 %v608_v57, %v607_v55 }
 0x171   :  { %v1687_v2 = vmul.f32 %v246_v62, %v1652_v54  ;;  %v434_v54 = vld [vmem:[#allocation7 + $0x130] sm:$0xff] }
 0x172   :  { %v1325_v10 = vpack.c.bf16 %v435_v9, %v434_v54  ;;  %v609_v62 = vld [vmem:[#allocation7 + $0x190] sm:$0xff]  ;;  %v616_v54 = vld [vmem:[#allocation7 + $0x1c8] sm:$0xff] }
 0x173   :  { %1042 = vmatmul.mubr.f32.vlgmr.msra.gmra.mrb[2].mxu0 %v1687_v2  ;;  %v265_v49 = vmul.f32 0.2, %v1687_v2 }
 0x174   :  { %1317 = vmatpush3.bf16.xpose.msra.mxu0 %v1316_v63  ;;  %1111 = vmatprep.mubr.msk.f32.mxu0 %vm1554_vm0, %v1555_v1  ;;  %v610_v63 = vld [vmem:[#allocation7 + $0x198] sm:$0xff] }
 0x175   :  { %1318 = vmatprep.subr.bf16.mxu0 %v1553_v0  ;;  %v1367_v3 = vpack.c.bf16 %v610_v63, %v609_v62 }
 0x17c   :  { %1320 = vmatpush3.bf16.xpose.msra.mxu0 %v1319_v5  ;;  %v612_v5 = vld [vmem:[#allocation7 + $0x1a8] sm:$0xff] }
 0x17d   :  { %1321 = vmatprep.subr.bf16.mxu0 %v1553_v0  ;;  %v1370_v6 = vpack.c.bf16 %v612_v5, %v611_v4 }
 0x184   :  { %1323 = vmatpush3.bf16.xpose.msra.mxu0 %v1322_v8 }
 0x185   :  { %1324 = vmatprep.subr.bf16.mxu0 %v1553_v0 }
 0x18c   :  { %1326 = vmatpush3.bf16.xpose.msra.mxu0 %v1325_v10  ;;  %v617_v10 = vld [vmem:[#allocation7 + $0x1d0] sm:$0xff] }
 0x18d   :  { %1327 = vmatprep.subr.bf16.mxu0 %v1553_v0  ;;  %v1379_v12 = vpack.c.bf16 %v618_v11, %v617_v10 }
 0x194   :  { %1329 = vmatpush3.bf16.xpose.msra.mxu0 %v1328_v13  ;;  %v704_v13 = vld [vmem:[#allocation8 + $0x1c0] sm:$0xff] }
 0x195   :  { %1330 = vmatprep.subr.bf16.mxu0 %v1553_v0  ;;  %v1400_v15 = vpack.c.bf16 %v705_v14, %v704_v13 }
 0x197   :  { %1401 = vmatpush3.bf16.xpose.msra.mxu1 %v1400_v15 }
 0x198   :  { %1402 = vmatprep.subr.bf16.mxu1 %v1553_v0 }
 0x19c   :  { %1332 = vmatpush3.bf16.xpose.msra.mxu0 %v1331_v16  ;;  %v619_v16 = vld [vmem:[#allocation7 + $0x1e0] sm:$0xff] }
 0x19d   :  { %1333 = vmatprep.subr.bf16.mxu0 %v1553_v0  ;;  %v1382_v18 = vpack.c.bf16 %v620_v17, %v619_v16 }
 0x19f   :  { %1404 = vmatpush3.bf16.xpose.msra.mxu1 %v1403_v23 }
 0x1a0   :  { %v420_v29 = vpop.f32.mrb[2].mxu1  ;;  %1405 = vmatprep.subr.bf16.mxu1 %v1553_v0 }
 0x1a1   :  { %v1078_v30 = vpop.f32.mrb[3].mxu1 }
 0x1a2   :  { %v710_v30 = vld [vmem:[#allocation8 + $0x1f0] sm:$0xff] }
 0x1a3   :  { %v1409_v32 = vpack.c.bf16 %v711_v31, %v710_v30 }
 0x1a4   :  { %1335 = vmatpush3.bf16.xpose.msra.mxu0 %v1334_v22  ;;  %v622_v22 = vld [vmem:[#allocation7 + $0x1f8] sm:$0xff] }
 0x1a5   :  { %1336 = vmatprep.subr.bf16.mxu0 %v1553_v0  ;;  %v1385_v24 = vpack.c.bf16 %v622_v22, %v621_v21 }
 0x1ac   :  { %1338 = vmatpush3.bf16.xpose.msra.mxu0 %v1337_v28  ;;  %v709_v28 = vld [vmem:[#allocation8 + $0x1e8] sm:$0xff] }
 0x1ad   :  { %1363 = vmatprep.subr.bf16.mxu0 %v1553_v0 }
 0x1e0   :  { %v599_v25 = vpop.f32.mrb[4].mxu1 }
 0x1e1   :  { %v1148_v26 = vpop.f32.mrb[5].mxu1 }
 0x246   :  { %v332_v50 = vpop.f32.mrb[2].mxu0 }
 0x247   :  { %v333_v51 = vadd.f32 %v332_v50, %v265_v49  ;;  %v1043_v52 = vpop.f32.mrb[3].mxu0 }
 0x249   :  { %v336_v53 = vadd.f32 0.10000012, %v333_v51 }
 0x24b   :  { %1423 = vrcp.f32 %v336_v53 }
 0x255   :  { %v1424_v58 = vpop.eup %1423 }
 0x256   :  { %v425_v59 = vmul.f32 %v1424_v58, %v420_v29  ;;  %v1406_v29 = vpack.c.bf16 %v709_v28, %v708_v27 }
 0x258   :  { %v1713_v61 = vmul.f32 %v425_v59, %v1687_v2  ;;  %v613_v2 = vld [vmem:[#allocation7 + $0x1b0] sm:$0xff]  ;;  %1407 = vmatpush3.bf16.xpose.msra.mxu1 %v1406_v29 }
 0x259   :  { %v1373_v8 = vpack.c.bf16 %v614_v7, %v613_v2  ;;  %1408 = vmatprep.subr.bf16.mxu1 %v1553_v0 }
 0x25a   :  { %1112 = vmatmul.mubr.f32.vlgmr.msra.gmra.mrb[4].mxu0 %v1713_v61  ;;  %v444_v33 = vmul.f32 0.2, %v1713_v61 }
 0x25b   :  { %1365 = vmatpush3.bf16.xpose.msra.mxu0 %v1364_v60  ;;  %1181 = vmatprep.mubr.msk.f32.mxu0 %vm1554_vm0, %v1555_v1  ;;  %v615_v1 = vld [vmem:[#allocation7 + $0x1c0] sm:$0xff] }
 0x25c   :  { %1366 = vmatprep.subr.bf16.mxu0 %v1553_v0  ;;  %v1376_v9 = vpack.c.bf16 %v616_v54, %v615_v1 }
 0x260   :  { %1410 = vmatpush3.bf16.xpose.msra.mxu1 %v1409_v32 }
 0x263   :  { %1368 = vmatpush3.bf16.xpose.msra.mxu0 %v1367_v3 }
 0x264   :  { %1369 = vmatprep.subr.bf16.mxu0 %v1553_v0 }
 0x267   :  { %1217 = vmatmul.mubr.f32.vlgmr.msra.gmra.mrb[6].mxu1 %v1654_v56 }
 0x26b   :  { %1371 = vmatpush3.bf16.xpose.msra.mxu0 %v1370_v6 }
 0x26c   :  { %1372 = vmatprep.subr.bf16.mxu0 %v1553_v0 }
 0x273   :  { %1374 = vmatpush3.bf16.xpose.msra.mxu0 %v1373_v8 }
 0x274   :  { %1375 = vmatprep.subr.bf16.mxu0 %v1553_v0 }
 0x27b   :  { %1377 = vmatpush3.bf16.xpose.msra.mxu0 %v1376_v9 }
 0x27c   :  { %1378 = vmatprep.subr.bf16.mxu0 %v1553_v0 }
 0x283   :  { %1380 = vmatpush3.bf16.xpose.msra.mxu0 %v1379_v12 }
 0x284   :  { %1381 = vmatprep.subr.bf16.mxu0 %v1553_v0 }
 0x28b   :  { %1383 = vmatpush3.bf16.xpose.msra.mxu0 %v1382_v18 }
 0x28c   :  { %1384 = vmatprep.subr.bf16.mxu0 %v1553_v0 }
 0x293   :  { %1386 = vmatpush3.bf16.xpose.msra.mxu0 %v1385_v24 }
 0x32d   :  { %v511_v34 = vpop.f32.mrb[4].mxu0 }
 0x32e   :  { %v512_v35 = vadd.f32 %v511_v34, %v444_v33  ;;  %v1113_v36 = vpop.f32.mrb[5].mxu0 }
 0x330   :  { %v515_v37 = vadd.f32 0.10000012, %v512_v35 }
 0x332   :  { %1425 = vrcp.f32 %v515_v37 }
 0x33a   :  { %v778_v41 = vpop.f32.mrb[6].mxu1 }
 0x33b   :  { %v1218_v0 = vpop.f32.mrb[7].mxu1 }
 0x33c   :  { %v1426_v38 = vpop.eup %1425 }
 0x33d   :  { %v604_v39 = vmul.f32 %v1426_v38, %v599_v25 }
 0x33f   :  { %v605_v40 = vmul.f32 %v604_v39, %v1713_v61 }
 0x341   :  { %1182 = vmatmul.mubr.f32.vlgmr.msra.gmra.mrb[6].mxu0 %v605_v40  ;;  %v623_v42 = vmul.f32 0.2, %v605_v40 }
 0x414   :  { %v690_v43 = vpop.f32.mrb[6].mxu0 }
 0x415   :  { %v691_v44 = vadd.f32 %v690_v43, %v623_v42  ;;  %v1183_v45 = vpop.f32.mrb[7].mxu0 }
 0x417   :  { %v694_v46 = vadd.f32 0.10000012, %v691_v44 }
 0x419   :  { %1427 = vrcp.f32 %v694_v46 }
 0x423   :  { %v1428_v56 = vpop.eup %1427 }
 0x424   :  { %v783_v47 = vmul.f32 %v1428_v56, %v778_v41 }
 0x426   :  { %v784_v48 = vmul.f32 %v783_v47, %v605_v40 }
 0x428   :  { %785 = vst [vmem:[#allocation10] sm:$0xff] %v784_v48 }
 0x429   :  { %1528 = shalt.err (!%p1525_p8)
}
 0x42a   :  { %s1529_s13 = scalar_lea.hbm %s1747_s4, 128 }
 0x42b   :  { %p1530_p9 = scmp.ne.s32.totalorder %s1747_s4, %s1529_s13  ;;  %p1533_p10 = scmp.lt.u32.totalorder %s1529_s13, %s1747_s4 }
 0x42d   :  { %p1535_p11 = pnand %p1533_p10, %p1530_p9 }
 0x42f   :  { %1538 = shalt.err (!%p1535_p11)
}
 0x430   :  { %795 = dma.vmem_to_hbm [thread:$0]  %s793_s10, 128, %s1747_s4, [#allocation4]  }
 0x431   :  { %1545 = dma.done.wait [#allocation4], 128  }
 0x432   :  { %1546 = vsyncadd [#allocation4], 4294967168 }
 0x433   :  { %799 = vsyncpa [#allocation3], 1 }
 0x434   :  { %800 = vsyncpa [#allocation6], 1 }
 0x435   :  { %801 = vsyncpa [#allocation9], 1 }
 0x436   :  { %802 = vsyncpa [#allocation4], 1 }

</bundles_post_ra>
